<compile_context>
chip_gen: v6e
topology: v6e:2x2x1
jax: 0.10.0
libtpu: 0.0.40
codegen_flags: <defaults>
</compile_context>

<pallas_src>
import jax
import jax.numpy as jnp
from jax.experimental import pallas as pl
from jax.experimental.pallas import tpu as pltpu


N_IN = 784  # MLPNet input features (28*28); kept UNPADDED.


def _round_up(v: int, m: int) -> int:
    return ((v + m - 1) // m) * m


# ----------------------------------------------------------------------------
# Kernel: three MXU matmuls with ReLU between them, one batch tile per step.
# x arrives in its original dtype (f32) and is cast to bf16 in-kernel.
# ----------------------------------------------------------------------------
def mlp_kernel(x_ref, w1_ref, w2_ref, w3_ref, o_ref):
    x = x_ref[...].astype(w1_ref.dtype)            # f32 -> bf16, in-kernel
    # lin1 + relu  (bf16 operands, f32 MXU accumulation, ReLU on f32 acc)
    h1 = jnp.dot(x, w1_ref[...], preferred_element_type=jnp.float32)
    h1 = jnp.maximum(h1, 0.0).astype(w2_ref.dtype)
    # lin2 + relu
    h2 = jnp.dot(h1, w2_ref[...], preferred_element_type=jnp.float32)
    h2 = jnp.maximum(h2, 0.0).astype(w3_ref.dtype)
    # fc1 (no activation), lane-dense bf16 store
    out = jnp.dot(h2, w3_ref[...], preferred_element_type=jnp.float32)
    o_ref[...] = out.astype(o_ref.dtype)


# ----------------------------------------------------------------------------
# One-time parameter prep (NOT in the per-forward hot path):
#   PyTorch weights are (out_features, in_features); transpose to (in, out),
#   zero-pad ONLY hidden/output dims to 128 lanes (K=784 stays unpadded),
#   cast to the compute dtype.  Zero padding is exact.
# ----------------------------------------------------------------------------
def prepare_params(w1, w2, w3, compute_dtype=jnp.bfloat16):
    n_hidden, n_in = w1.shape
    assert n_in == N_IN, f"expected {N_IN} input features, got {n_in}"
    n_out = w3.shape[0]
    H = _round_up(n_hidden, 128)   # e.g. 32 -> 128, 100 -> 128
    N = _round_up(n_out, 128)      # 10 -> 128

    w1_t = jnp.zeros((n_in, H), compute_dtype).at[:, :n_hidden].set(
        w1.T.astype(compute_dtype))
    w2_t = jnp.zeros((H, H), compute_dtype).at[:n_hidden, :n_hidden].set(
        w2.T.astype(compute_dtype))
    w3_t = jnp.zeros((H, N), compute_dtype).at[:n_hidden, :n_out].set(
        w3.T.astype(compute_dtype))
    return w1_t, w2_t, w3_t


def _choose_block_b(B: int, max_block_b: int = 1024) -> int:
    """Large tiles amortize the ~0.35us per-grid-step overhead; keep >= 2
    tiles for big batches so v7x's two TensorCores both get work."""
    if B <= 128:
        # single tile; round to 16 sublanes (bf16 packs 2 rows per sublane)
        return _round_up(max(B, 1), 16)
    return min(max_block_b, _round_up(pl.cdiv(B, 2), 128))


# ----------------------------------------------------------------------------
# Forward: x unpadded in the feature dim, batch dim padded only when needed.
# ----------------------------------------------------------------------------
def mlp_forward_padded(x, w1_t, w2_t, w3_t, *, out_dtype=jnp.bfloat16,
                       max_block_b=1024):
    """Returns the lane-dense padded output slab (B_pad, 128)."""
    B, n_in = x.shape
    K, H = w1_t.shape
    N = w3_t.shape[1]
    assert n_in == K == N_IN

    bm = _choose_block_b(B, max_block_b)
    B_pad = _round_up(B, bm)
    if B_pad != B:
        # Pad ONLY the batch dim (cheap); feature dim stays 784, dtype stays
        # the caller's dtype -- no wrapper-side cast/pad pass over x.
        x = jnp.pad(x, ((0, B_pad - B), (0, 0)))

    x_item = jnp.dtype(x.dtype).itemsize
    w_item = jnp.dtype(w1_t.dtype).itemsize
    flops = 2 * B_pad * (K * H + H * H + H * N)
    bytes_accessed = (
        B_pad * K * x_item
        + (w1_t.size + w2_t.size + w3_t.size) * w_item
        + B_pad * N * jnp.dtype(out_dtype).itemsize)

    return pl.pallas_call(
        mlp_kernel,
        out_shape=jax.ShapeDtypeStruct((B_pad, N), out_dtype),
        grid_spec=pl.GridSpec(
            grid=(B_pad // bm,),
            in_specs=[
                pl.BlockSpec((bm, K), lambda i: (i, 0)),   # x: batch-tiled, K unpadded
                pl.BlockSpec((K, H), lambda i: (0, 0)),    # weights: constant index_map
                pl.BlockSpec((H, H), lambda i: (0, 0)),    #   -> VMEM-resident across grid
                pl.BlockSpec((H, N), lambda i: (0, 0)),
            ],
            out_specs=pl.BlockSpec((bm, N), lambda i: (i, 0)),
        ),
        compiler_params=pltpu.CompilerParams(
            dimension_semantics=("parallel",),
        ),
        cost_estimate=pl.CostEstimate(
            flops=flops, transcendentals=0, bytes_accessed=bytes_accessed),
    )(x, w1_t, w2_t, w3_t)


def mlp_forward(x, w1_t, w2_t, w3_t, n_outputs, **kw):
    """Module-compatible forward: (B, n_outputs) logits.  Consumers that can
    take the padded (B_pad, 128) bf16 slab should call mlp_forward_padded
    directly and skip this slice (it is an extra pass over the output)."""
    out_p = mlp_forward_padded(x, w1_t, w2_t, w3_t, **kw)
    return out_p[:x.shape[0], :n_outputs]


# ----------------------------------------------------------------------------
# References
# ----------------------------------------------------------------------------
def reference_forward_bf16(x, w1, w2, w3, compute_dtype=jnp.bfloat16):
    """Same numerics as the kernel: bf16 operands, f32 accumulation."""
    xb = x.astype(compute_dtype)
    w1b, w2b, w3b = (w.astype(compute_dtype) for w in (w1, w2, w3))
    h = jnp.dot(xb, w1b.T, preferred_element_type=jnp.float32)
    h = jnp.maximum(h, 0.0).astype(compute_dtype)
    h = jnp.dot(h, w2b.T, preferred_element_type=jnp.float32)
    h = jnp.maximum(h, 0.0).astype(compute_dtype)
    return jnp.dot(h, w3b.T, preferred_element_type=jnp.float32)


def reference_forward_f32(x, w1, w2, w3):
    h = jnp.maximum(x @ w1.T, 0.0)
    h = jnp.maximum(h @ w2.T, 0.0)
    return h @ w3.T


def _run_case(key, batch, n_hidden, n_outputs):
    n_in = N_IN
    kx, k1, k2, k3 = jax.random.split(key, 4)
    x = jax.random.normal(kx, (batch, n_in), dtype=jnp.float32)
    # PyTorch (out_features, in_features) layout.
    w1 = jax.random.normal(k1, (n_hidden, n_in), jnp.float32) / jnp.sqrt(n_in)
    w2 = jax.random.normal(k2, (n_hidden, n_hidden), jnp.float32) / jnp.sqrt(n_hidden)
    w3 = jax.random.normal(k3, (n_outputs, n_hidden), jnp.float32) / jnp.sqrt(n_hidden)

    # One-time prep (transpose/pad/cast) -- hoisted out of the forward path.
    w1_t, w2_t, w3_t = prepare_params(w1, w2, w3)

    out = mlp_forward(x, w1_t, w2_t, w3_t, n_outputs)
    out = jax.block_until_ready(out)
    assert out.shape == (batch, n_outputs)
    out32 = out.astype(jnp.float32)

    # vs bf16-semantics reference (extra slack for the bf16 output store).
    ref = reference_forward_bf16(x, w1, w2, w3)
    assert jnp.allclose(out32, ref, atol=3e-2, rtol=3e-2), \
        f"mismatch vs bf16 reference (max |d|={jnp.max(jnp.abs(out32 - ref))})"

    # Sanity vs the pure-f32 PyTorch-semantics reference (loose: bf16 MXU).
    ref32 = reference_forward_f32(x, w1, w2, w3)
    assert jnp.max(jnp.abs(out32 - ref32)) < 0.3, "diverged from f32 reference"
    return out


if __name__ == "__main__":
    # TODO(synk): the PyTorch module also stashes activations in self.act
    # (a Python-side OrderedDict side effect); not part of the compute graph,
    # so not reproduced in the kernel.
    key = jax.random.PRNGKey(0)
    k_small, k_big = jax.random.split(key)

    # Small shapes consistent with MLPNet's forward (784-in, small hidden/out).
    _run_case(k_small, batch=8, n_hidden=32, n_outputs=10)

    # Module-default hidden size with a multi-tile batch to exercise the grid
    # (256 rows -> two 128-row batch tiles; weights VMEM-resident across both,
    # and both v7x TensorCores get a tile).
    _run_case(k_big, batch=256, n_hidden=100, n_outputs=10)

    print("KERNEL_OK")
</pallas_src>

<mosaic_0001>
module attributes {stable_mosaic.version = 11 : i64} {
  func.func @mlp_kernel(%arg0: i32, %arg1: memref<16x784xf32, #tpu.memory_space<vmem>>, %arg2: memref<784x128xbf16, #tpu.memory_space<vmem>>, %arg3: memref<128x128xbf16, #tpu.memory_space<vmem>>, %arg4: memref<128x128xbf16, #tpu.memory_space<vmem>>, %arg5: memref<16x128xbf16, #tpu.memory_space<vmem>>) attributes {dimension_semantics = [#tpu.dimension_semantics<parallel>], iteration_bounds = array<i64: 1>, scalar_prefetch = 0 : i64, scratch_operands = 0 : i64, tpu.core_type = #tpu.core_type<tc>, window_params = [{transform_indices = @transform_0, window_bounds = array<i64: 16, 784>}, {pipeline_mode = #tpu.pipeline_mode<synchronous>, transform_indices = @transform_1, window_bounds = array<i64: 784, 128>}, {pipeline_mode = #tpu.pipeline_mode<synchronous>, transform_indices = @transform_2, window_bounds = array<i64: 128, 128>}, {pipeline_mode = #tpu.pipeline_mode<synchronous>, transform_indices = @transform_3, window_bounds = array<i64: 128, 128>}, {transform_indices = @transform_4, window_bounds = array<i64: 16, 128>}]} {
    %c0 = arith.constant 0 : index
    %c0_0 = arith.constant 0 : index
    %0 = vector.load %arg1[%c0, %c0_0] : memref<16x784xf32, #tpu.memory_space<vmem>>, vector<16x784xf32>
    %1 = arith.truncf %0 : vector<16x784xf32> to vector<16x784xbf16>
    %c0_1 = arith.constant 0 : index
    %c0_2 = arith.constant 0 : index
    %2 = vector.load %arg2[%c0_1, %c0_2] : memref<784x128xbf16, #tpu.memory_space<vmem>>, vector<784x128xbf16>
    %cst = arith.constant dense<0.000000e+00> : vector<16x128xf32>
    %3 = tpu.matmul %1, %2, %cst {dimension_numbers = #tpu.dot_dimension_numbers<[1], [0], [0], [1], [0, 0, 1, 1], [], []>} : vector<16x784xbf16>, vector<784x128xbf16>, vector<16x128xf32> -> vector<16x128xf32>
    %cst_3 = arith.constant 0.000000e+00 : f32
    %4 = vector.broadcast %cst_3 : f32 to vector<16x128xf32>
    %5 = arith.maximumf %3, %4 : vector<16x128xf32>
    %6 = arith.truncf %5 : vector<16x128xf32> to vector<16x128xbf16>
    %c0_4 = arith.constant 0 : index
    %c0_5 = arith.constant 0 : index
    %7 = vector.load %arg3[%c0_4, %c0_5] : memref<128x128xbf16, #tpu.memory_space<vmem>>, vector<128x128xbf16>
    %cst_6 = arith.constant dense<0.000000e+00> : vector<16x128xf32>
    %8 = tpu.matmul %6, %7, %cst_6 {dimension_numbers = #tpu.dot_dimension_numbers<[1], [0], [0], [1], [0, 0, 1, 1], [], []>} : vector<16x128xbf16>, vector<128x128xbf16>, vector<16x128xf32> -> vector<16x128xf32>
    %cst_7 = arith.constant 0.000000e+00 : f32
    %9 = vector.broadcast %cst_7 : f32 to vector<16x128xf32>
    %10 = arith.maximumf %8, %9 : vector<16x128xf32>
    %11 = arith.truncf %10 : vector<16x128xf32> to vector<16x128xbf16>
    %c0_8 = arith.constant 0 : index
    %c0_9 = arith.constant 0 : index
    %12 = vector.load %arg4[%c0_8, %c0_9] : memref<128x128xbf16, #tpu.memory_space<vmem>>, vector<128x128xbf16>
    %cst_10 = arith.constant dense<0.000000e+00> : vector<16x128xf32>
    %13 = tpu.matmul %11, %12, %cst_10 {dimension_numbers = #tpu.dot_dimension_numbers<[1], [0], [0], [1], [0, 0, 1, 1], [], []>} : vector<16x128xbf16>, vector<128x128xbf16>, vector<16x128xf32> -> vector<16x128xf32>
    %14 = arith.truncf %13 : vector<16x128xf32> to vector<16x128xbf16>
    %c0_11 = arith.constant 0 : index
    %c0_12 = arith.constant 0 : index
    %15 = vector.load %arg5[%c0_11, %c0_12] : memref<16x128xbf16, #tpu.memory_space<vmem>>, vector<16x128xbf16>
    tpu.vector_store %arg5[%c0_11, %c0_12], %14 {strides = array<i32>} : memref<16x128xbf16, #tpu.memory_space<vmem>>, vector<16x128xbf16>,
    return
  }
  func.func @transform_0(%arg0: i32) -> (i32, i32) {
    %c0_i32 = arith.constant 0 : i32
    %c0_i32_0 = arith.constant 0 : i32
    return %arg0, %c0_i32 : i32, i32
  }
  func.func @transform_1(%arg0: i32) -> (i32, i32) {
    %c0_i32 = arith.constant 0 : i32
    %c0_i32_0 = arith.constant 0 : i32
    %c0_i32_1 = arith.constant 0 : i32
    return %c0_i32, %c0_i32_0 : i32, i32
  }
  func.func @transform_2(%arg0: i32) -> (i32, i32) {
    %c0_i32 = arith.constant 0 : i32
    %c0_i32_0 = arith.constant 0 : i32
    %c0_i32_1 = arith.constant 0 : i32
    return %c0_i32, %c0_i32_0 : i32, i32
  }
  func.func @transform_3(%arg0: i32) -> (i32, i32) {
    %c0_i32 = arith.constant 0 : i32
    %c0_i32_0 = arith.constant 0 : i32
    %c0_i32_1 = arith.constant 0 : i32
    return %c0_i32, %c0_i32_0 : i32, i32
  }
  func.func @transform_4(%arg0: i32) -> (i32, i32) {
    %c0_i32 = arith.constant 0 : i32
    %c0_i32_0 = arith.constant 0 : i32
    return %arg0, %c0_i32 : i32, i32
  }
}

</mosaic_0001>

<bundles_post_ra>
// kernel: tpu_custom_call.1
= control target key start
LH: loop header
LB: loop body
LE: loop exit
PB: predicated region body
PF: predicated region fallthrough
CT: control target
= control target key end

     0   :  { %9 = vsyncpa [#allocation3], 0  ;;  %s1377_s0 = inlined_call_operand.hbm [shape: f32[16,784], index: 0, kind: input, shape index: {}]   ;;  %s1378_s1 = inlined_call_operand.hbm [shape: bf16[784,128], index: 1, kind: input, shape index: {}]   ;;  %s1379_s2 = inlined_call_operand.hbm [shape: bf16[128,128], index: 2, kind: input, shape index: {}]   ;;  %s1380_s3 = inlined_call_operand.hbm [shape: bf16[128,128], index: 3, kind: input, shape index: {}]   ;;  %s1381_s4 = inlined_call_operand.hbm [shape: bf16[16,128], index: 4, kind: output, shape index: {}]  }
   0x1   :  { %10 = vsyncpa [#allocation6], 0 }
   0x2   :  { %11 = vsyncpa [#allocation9], 0 }
   0x3   :  { %12 = vsyncpa [#allocation4], 0  ;;  %s1291_s15 = smov [#allocation5]  }
   0x4   :  { %s30_s16 = sshll.u32 %s1291_s15, 4  ;;  %s31_s16 = int_to_ptr.vmem [resolvable:$true] %s30_s16 }
   0x5   :  { %s1191_s17 = scalar_lea.vmem %s31_s16, 6272  ;;  %p1196_p1 = scmp.lt.s32.totalorder %s31_s16, %s31_s16 }
   0x6   :  { %p1192_p0 = scmp.ne.s32.totalorder %s31_s16, %s1191_s17  ;;  %p1197_p2 = scmp.lt.s32.totalorder %s1191_s17, %s1191_s17 }
   0x8   :  { %p1198_p3 = por %p1197_p2, %p1196_p1 }
   0xa   :  { %p1199_p4 = pnand %p1198_p3, %p1192_p0 }
   0xc   :  { %1202 = shalt.err (!%p1199_p4)
}
   0xd   :  { %s1292_s18 = smov 64   ;;  %s1293_s19 = smov 4  }
   0xe   :  { %36 = dma.hbm_to_vmem [thread:$0]  %s1378_s1, 6272, %s31_s16, [#allocation6], %s1292_s18, %s1292_s18, %s1293_s19  }
   0xf   :  { %s1294_s22 = smov [#allocation2]  }
  0x10   :  { %s18_s23 = sshll.u32 %s1294_s22, 4  ;;  %s19_s23 = int_to_ptr.vmem [resolvable:$true] %s18_s23 }
  0x11   :  { %s1211_s24 = scalar_lea.vmem %s19_s23, 1792  ;;  %p1216_p6 = scmp.lt.s32.totalorder %s19_s23, %s19_s23 }
  0x12   :  { %p1212_p5 = scmp.ne.s32.totalorder %s19_s23, %s1211_s24  ;;  %p1217_p7 = scmp.lt.s32.totalorder %s1211_s24, %s1211_s24 }
  0x14   :  { %p1218_p8 = por %p1217_p7, %p1216_p6 }
  0x16   :  { %p1219_p9 = pnand %p1218_p8, %p1212_p5 }
  0x18   :  { %1222 = shalt.err (!%p1219_p9)
}
  0x19   :  { %s1295_s25 = smov 896   ;;  %s1296_s26 = smov 56  }
  0x1a   :  { %24 = dma.hbm_to_vmem [thread:$0]  %s1377_s0, 1792, %s19_s23, [#allocation3], %s1295_s25, %s1295_s25, %s1296_s26  }
  0x1b   :  { %s1297_s29 = smov [#allocation7]   ;;  %s1298_s5 = smov [#allocation8]  }
  0x1c   :  { %s42_s30 = sshll.u32 %s1297_s29, 4  ;;  %s54_s1 = sshll.u32 %s1298_s5, 4  ;;  %s43_s30 = int_to_ptr.vmem [resolvable:$true] %s42_s30  ;;  %s55_s1 = int_to_ptr.vmem [resolvable:$true] %s54_s1 }
  0x1d   :  { %s1231_s6 = scalar_lea.vmem %s43_s30, 1024  ;;  %p1236_p11 = scmp.lt.s32.totalorder %s43_s30, %s43_s30 }
  0x1e   :  { %p1232_p10 = scmp.ne.s32.totalorder %s43_s30, %s1231_s6  ;;  %p1237_p12 = scmp.lt.s32.totalorder %s1231_s6, %s1231_s6 }
  0x20   :  { %p1238_p13 = por %p1237_p12, %p1236_p11 }
  0x22   :  { %p1239_p0 = pnand %p1238_p13, %p1232_p10 }
  0x24   :  { %1242 = shalt.err (!%p1239_p0)
}
  0x25   :  { %48 = dma.hbm_to_vmem [thread:$0]  %s1379_s2, 1024, %s43_s30, [#allocation6], %s1292_s18, %s1292_s18, %s1293_s19  }
  0x26   :  { %s1251_s0 = scalar_lea.vmem %s55_s1, 1024  ;;  %p1256_p2 = scmp.lt.s32.totalorder %s55_s1, %s55_s1 }
  0x27   :  { %p1252_p1 = scmp.ne.s32.totalorder %s55_s1, %s1251_s0  ;;  %p1257_p3 = scmp.lt.s32.totalorder %s1251_s0, %s1251_s0 }
  0x29   :  { %p1258_p4 = por %p1257_p3, %p1256_p2 }
  0x2b   :  { %p1259_p5 = pnand %p1258_p4, %p1252_p1 }
  0x2d   :  { %1262 = shalt.err (!%p1259_p5)
}
  0x2e   :  { %60 = dma.hbm_to_vmem [thread:$0]  %s1380_s3, 1024, %s55_s1, [#allocation9], %s1292_s18, %s1292_s18, %s1293_s19  }
  0x2f   :  { %1283 = dma.done.wait [#allocation3], 1792  }
  0x30   :  { %1284 = vsyncadd [#allocation3], 4294965504 }
  0x31   :  { %1285 = dma.done.wait [#allocation6], 7296  }
  0x32   :  { %1286 = vsyncadd [#allocation6], 4294960000 }
  0x33   :  { %1287 = dma.done.wait [#allocation9], 1024  }
  0x34   :  { %1288 = vsyncadd [#allocation9], 4294966272  ;;  %v1118_v0 = vld [vmem:[#allocation5 + $0x78] sm:$0xff]   ;;  %v1122_v4 = vld [vmem:[#allocation5 + $0x70] sm:$0xff]   ;;  %v1299_v43 = vmov 0.0   ;;  %vm1300_vm0 = vmmov 0  }
  0x35   :  { %v1119_v1 = vld [vmem:[#allocation5 + $0xf8] sm:$0xff]   ;;  %975 = vmatprep.subr.bf16.mxu0 %v1118_v0  ;;  %v1123_v5 = vld [vmem:[#allocation5 + $0xf0] sm:$0xff]   ;;  %v1126_v8 = vld [vmem:[#allocation5 + $0x68] sm:$0xff]   ;;  %vm487_vm1 = vcmask 130048   ;;  %s1301_s2 = smov [#allocation10]  }
  0x36   :  { %v1120_v2 = vld [vmem:[#allocation5 + $0x38] sm:$0xff]   ;;  %997 = vmatprep.subr.bf16.mxu1 %v1119_v1  ;;  %v1124_v6 = vld [vmem:[#allocation5 + $0x30] sm:$0xff]   ;;  %v1127_v9 = vld [vmem:[#allocation5 + $0xe8] sm:$0xff]   ;;  %s886_s3 = sshll.u32 %s1301_s2, 4  ;;  %s887_s3 = int_to_ptr.vmem [resolvable:$true] %s886_s3 }
  0x37   :  { %v1121_v3 = vld [vmem:[#allocation5 + $0xb8] sm:$0xff]   ;;  %976 = vmatpush3.bf16.msra.mxu0 %v1120_v2  ;;  %v1125_v7 = vld [vmem:[#allocation5 + $0xb0] sm:$0xff]   ;;  %v1128_v10 = vld [vmem:[#allocation5 + $0x28] sm:$0xff]   ;;  %s1263_s11 = scalar_lea.vmem %s887_s3, 128  ;;  %p1268_p7 = scmp.lt.s32.totalorder %s887_s3, %s887_s3 }
  0x38   :  { %998 = vmatpush3.bf16.msra.mxu1 %v1121_v3  ;;  %977 = vmatprep.subr.bf16.mxu0 %v1122_v4  ;;  %v1129_v11 = vld [vmem:[#allocation5 + $0xa8] sm:$0xff]   ;;  %v1130_v12 = vld [vmem:[#allocation5 + $0x60] sm:$0xff]   ;;  %v1134_v16 = vld [vmem:[#allocation5 + $0x58] sm:$0xff]   ;;  %p1264_p6 = scmp.ne.s32.totalorder %s887_s3, %s1263_s11  ;;  %p1269_p8 = scmp.lt.s32.totalorder %s1263_s11, %s1263_s11 }
  0x39   :  { %999 = vmatprep.subr.bf16.mxu1 %v1123_v5  ;;  %v1131_v13 = vld [vmem:[#allocation5 + $0xe0] sm:$0xff]   ;;  %v1135_v17 = vld [vmem:[#allocation5 + $0xd8] sm:$0xff]   ;;  %v1138_v20 = vld [vmem:[#allocation5 + $0x50] sm:$0xff]  }
  0x3a   :  { %v1132_v14 = vld [vmem:[#allocation5 + $0x20] sm:$0xff]   ;;  %v1136_v18 = vld [vmem:[#allocation5 + $0x18] sm:$0xff]   ;;  %v1139_v21 = vld [vmem:[#allocation5 + $0xd0] sm:$0xff]   ;;  %p1270_p9 = por %p1269_p8, %p1268_p7 }
  0x3b   :  { %978 = vmatpush3.bf16.msra.mxu0 %v1124_v6  ;;  %v1133_v15 = vld [vmem:[#allocation5 + $0xa0] sm:$0xff]   ;;  %v1137_v19 = vld [vmem:[#allocation5 + $0x98] sm:$0xff]   ;;  %v1140_v22 = vld [vmem:[#allocation5 + $0x10] sm:$0xff]  }
  0x3c   :  { %1000 = vmatpush3.bf16.msra.mxu1 %v1125_v7  ;;  %979 = vmatprep.subr.bf16.mxu0 %v1126_v8  ;;  %v1141_v23 = vld [vmem:[#allocation5 + $0x90] sm:$0xff]   ;;  %v1142_v24 = vld [vmem:[#allocation5 + $0x48] sm:$0xff]   ;;  %v1146_v28 = vld [vmem:[#allocation5 + $0x40] sm:$0xff]   ;;  %p1271_p10 = pnand %p1270_p9, %p1264_p6 }
  0x3d   :  { %1001 = vmatprep.subr.bf16.mxu1 %v1127_v9  ;;  %v1143_v25 = vld [vmem:[#allocation5 + $0xc8] sm:$0xff]   ;;  %v1147_v29 = vld [vmem:[#allocation5 + $0xc0] sm:$0xff]   ;;  %v75_v32 = vld [vmem:[#allocation2 + $0x8] sm:$0xff] }
  0x3e   :  { %v1144_v26 = vld [vmem:[#allocation5 + $0x8] sm:$0xff]   ;;  %v1148_v30 = vld [vmem:[#allocation5] sm:$0xff]   ;;  %v82_v33 = vld [vmem:[#allocation2 + $0x40] sm:$0xff] }
  0x3f   :  { %980 = vmatpush3.bf16.msra.mxu0 %v1128_v10  ;;  %v1145_v27 = vld [vmem:[#allocation5 + $0x88] sm:$0xff]   ;;  %v1149_v31 = vld [vmem:[#allocation5 + $0x80] sm:$0xff]   ;;  %v89_v35 = vpack.c.bf16 %v82_v33, %v75_v32  ;;  %v74_v37 = vld [vmem:[#allocation2] sm:$0xff] }
  0x40   :  { %1002 = vmatpush3.bf16.msra.mxu1 %v1129_v11  ;;  %981 = vmatprep.subr.bf16.mxu0 %v1130_v12  ;;  %v77_v34 = vld [vmem:[#allocation2 + $0x18] sm:$0xff]  ;;  %v84_v36 = vld [vmem:[#allocation2 + $0x50] sm:$0xff]  ;;  %v83_v42 = vld [vmem:[#allocation2 + $0x48] sm:$0xff] }
  0x41   :  { %1003 = vmatprep.subr.bf16.mxu1 %v1131_v13  ;;  %v81_v38 = vld [vmem:[#allocation2 + $0x38] sm:$0xff]  ;;  %v91_v39 = vpack.c.bf16 %v84_v36, %v77_v34  ;;  %v76_v41 = vld [vmem:[#allocation2 + $0x10] sm:$0xff]  ;;  %523 = vmatprep.mubr.bf16.mxu0 %v89_v35  ;;  %v1150_v45 = vld [vmem:[#allocation5 + $0x178] sm:$0xff]  }
  0x42   :  { %v88_v40 = vpack.c.bf16 %v81_v38, %v74_v37  ;;  %v90_v44 = vpack.c.bf16 %v83_v42, %v76_v41  ;;  %v1151_v46 = vld [vmem:[#allocation5 + $0x138] sm:$0xff]   ;;  %v1152_v47 = vld [vmem:[#allocation5 + $0x170] sm:$0xff]   ;;  %v1154_v49 = vld [vmem:[#allocation5 + $0x168] sm:$0xff]  }
  0x43   :  { %982 = vmatpush3.bf16.msra.mxu0 %v1132_v14  ;;  %564 = vmatprep.mubr.bf16.mxu1 %v91_v39  ;;  %v1153_v48 = vld [vmem:[#allocation5 + $0x130] sm:$0xff]   ;;  %v1155_v50 = vld [vmem:[#allocation5 + $0x128] sm:$0xff]   ;;  %v1156_v51 = vld [vmem:[#allocation5 + $0x160] sm:$0xff]  }
  0x44   :  { %1004 = vmatpush3.bf16.msra.mxu1 %v1133_v15  ;;  %983 = vmatprep.subr.bf16.mxu0 %v1134_v16  ;;  %v1157_v52 = vld [vmem:[#allocation5 + $0x120] sm:$0xff]   ;;  %v1158_v53 = vld [vmem:[#allocation5 + $0x158] sm:$0xff]   ;;  %v1160_v55 = vld [vmem:[#allocation5 + $0x150] sm:$0xff]  }
  0x45   :  { %1005 = vmatprep.subr.bf16.mxu1 %v1135_v17  ;;  %v1159_v54 = vld [vmem:[#allocation5 + $0x118] sm:$0xff]   ;;  %v1166_v56 = vld [vmem:[#allocation5 + $0x180] sm:$0xff]   ;;  %v1161_v58 = vld [vmem:[#allocation5 + $0x110] sm:$0xff]  }
  0x46   :  { %v79_v57 = vld [vmem:[#allocation2 + $0x28] sm:$0xff]  ;;  %v86_v59 = vld [vmem:[#allocation2 + $0x60] sm:$0xff]  ;;  %v1162_v60 = vld [vmem:[#allocation5 + $0x148] sm:$0xff]  }
  0x47   :  { %984 = vmatpush3.bf16.msra.mxu0 %v1136_v18  ;;  %v93_v61 = vpack.c.bf16 %v86_v59, %v79_v57  ;;  %v80_v62 = vld [vmem:[#allocation2 + $0x30] sm:$0xff]  ;;  %v87_v63 = vld [vmem:[#allocation2 + $0x68] sm:$0xff]  ;;  %v1163_v1 = vld [vmem:[#allocation5 + $0x108] sm:$0xff]  }
  0x48   :  { %1006 = vmatpush3.bf16.msra.mxu1 %v1137_v19  ;;  %985 = vmatprep.subr.bf16.mxu0 %v1138_v20  ;;  %v94_v0 = vpack.c.bf16 %v87_v63, %v80_v62  ;;  %v1164_v2 = vld [vmem:[#allocation5 + $0x140] sm:$0xff]   ;;  %v78_v4 = vld [vmem:[#allocation2 + $0x20] sm:$0xff]  ;;  %v85_v5 = vld [vmem:[#allocation2 + $0x58] sm:$0xff] }
  0x49   :  { %1007 = vmatprep.subr.bf16.mxu1 %v1139_v21  ;;  %v1165_v3 = vld [vmem:[#allocation5 + $0x100] sm:$0xff]   ;;  %v92_v6 = vpack.c.bf16 %v85_v5, %v78_v4  ;;  %v1168_v8 = vld [vmem:[#allocation7 + $0x30] sm:$0xff]   ;;  %v1169_v9 = vld [vmem:[#allocation7 + $0x28] sm:$0xff]  }
  0x4a   :  { %v1167_v7 = vld [vmem:[#allocation7 + $0x38] sm:$0xff]   ;;  %v1170_v10 = vld [vmem:[#allocation7 + $0x20] sm:$0xff]   ;;  %v1172_v12 = vld [vmem:[#allocation7 + $0x10] sm:$0xff]  }
  0x4b   :  { %986 = vmatpush3.bf16.msra.mxu0 %v1140_v22  ;;  %v1171_v11 = vld [vmem:[#allocation7 + $0x18] sm:$0xff]   ;;  %v1173_v13 = vld [vmem:[#allocation7 + $0x8] sm:$0xff]   ;;  %v1174_v14 = vld [vmem:[#allocation7] sm:$0xff]  }
  0x4c   :  { %1008 = vmatpush3.bf16.msra.mxu1 %v1141_v23  ;;  %987 = vmatprep.subr.bf16.mxu0 %v1142_v24  ;;  %v1175_v15 = vld [vmem:[#allocation8 + $0x38] sm:$0xff]   ;;  %v1176_v16 = vld [vmem:[#allocation8 + $0x30] sm:$0xff]   ;;  %v1177_v17 = vld [vmem:[#allocation8 + $0x28] sm:$0xff]  }
  0x4d   :  { %1009 = vmatprep.subr.bf16.mxu1 %v1143_v25  ;;  %v1178_v18 = vld [vmem:[#allocation8 + $0x20] sm:$0xff]   ;;  %v1179_v19 = vld [vmem:[#allocation8 + $0x18] sm:$0xff]   ;;  %v1180_v20 = vld [vmem:[#allocation8 + $0x10] sm:$0xff]  }
  0x4f   :  { %988 = vmatpush3.bf16.msra.mxu0 %v1144_v26 }
  0x50   :  { %1010 = vmatpush3.bf16.msra.mxu1 %v1145_v27  ;;  %989 = vmatprep.subr.bf16.mxu0 %v1146_v28 }
  0x51   :  { %1011 = vmatprep.subr.bf16.mxu1 %v1147_v29 }
  0x53   :  { %990 = vmatpush3.bf16.msra.mxu0 %v1148_v30 }
  0x54   :  { %1012 = vmatpush3.bf16.msra.mxu1 %v1149_v31  ;;  %1019 = vmatprep.subr.bf16.mxu0 %v1150_v45 }
  0x55   :  { %1061 = vmatprep.subr.bf16.mxu1 %v1299_v43 }
  0x56   :  { %524 = vmatmul.mubr.bf16.vlgmr.msra.gmra.mxu0 %v88_v40 }
  0x57   :  { %565 = vmatmul.mubr.bf16.vlgmr.msra.gmra.mxu1 %v90_v44  ;;  %1020 = vmatpush3.bf16.msra.mxu0 %v1151_v46 }
  0x58   :  { %1063 = vmatprep.mubr.msk.bf16.mxu1 %vm1300_vm0, %v1299_v43  ;;  %1021 = vmatprep.subr.bf16.mxu0 %v1152_v47 }
  0x59   :  { %1062 = vmatpush3.bf16.msra.mxu1 %v1166_v56  ;;  %605 = vmatprep.mubr.bf16.mxu0 %v93_v61 }
  0x5a   :  { %1067 = vmatprep.subr.bf16.mxu1 %v1299_v43 }
  0x5b   :  { %1022 = vmatpush3.bf16.msra.mxu0 %v1153_v48 }
  0x5c   :  { %1023 = vmatprep.subr.bf16.mxu0 %v1154_v49 }
  0x5f   :  { %1024 = vmatpush3.bf16.msra.mxu0 %v1155_v50  ;;  %1064 = vmatmul.mubr.msk.bf16.vlgmr.msra.gmra.mxu1 %vm487_vm1, %v94_v0 }
  0x60   :  { %1025 = vmatprep.subr.bf16.mxu0 %v1156_v51  ;;  %1083 = vmatprep.mubr.msk.bf16.mxu1 %vm1300_vm0, %v1299_v43 }
  0x61   :  { %1068 = vmatpush3.bf16.msra.mxu1 %v1167_v7 }
  0x62   :  { %1069 = vmatprep.subr.bf16.mxu1 %v1299_v43 }
  0x63   :  { %1026 = vmatpush3.bf16.msra.mxu0 %v1157_v52 }
  0x64   :  { %1027 = vmatprep.subr.bf16.mxu0 %v1158_v53  ;;  %v1181_v53 = vld [vmem:[#allocation8 + $0x8] sm:$0xff]  }
  0x65   :  { %1070 = vmatpush3.bf16.msra.mxu1 %v1168_v8 }
  0x66   :  { %1071 = vmatprep.subr.bf16.mxu1 %v1299_v43 }
  0x67   :  { %1028 = vmatpush3.bf16.msra.mxu0 %v1159_v54  ;;  %v1182_v54 = vld [vmem:[#allocation8] sm:$0xff]  }
  0x68   :  { %1029 = vmatprep.subr.bf16.mxu0 %v1160_v55 }
  0x69   :  { %1072 = vmatpush3.bf16.msra.mxu1 %v1169_v9 }
  0x6a   :  { %1073 = vmatprep.subr.bf16.mxu1 %v1299_v43 }
  0x6b   :  { %1030 = vmatpush3.bf16.msra.mxu0 %v1161_v58 }
  0x6c   :  { %1031 = vmatprep.subr.bf16.mxu0 %v1162_v60 }
  0x6d   :  { %1074 = vmatpush3.bf16.msra.mxu1 %v1170_v10 }
  0x6e   :  { %1075 = vmatprep.subr.bf16.mxu1 %v1299_v43 }
  0x6f   :  { %1032 = vmatpush3.bf16.msra.mxu0 %v1163_v1 }
  0x70   :  { %1033 = vmatprep.subr.bf16.mxu0 %v1164_v2 }
  0x71   :  { %1076 = vmatpush3.bf16.msra.mxu1 %v1171_v11 }
  0x72   :  { %1077 = vmatprep.subr.bf16.mxu1 %v1299_v43 }
  0x73   :  { %1034 = vmatpush3.bf16.msra.mxu0 %v1165_v3 }
  0x74   :  { %1087 = vmatprep.subr.bf16.mxu0 %v1299_v43 }
  0x75   :  { %1078 = vmatpush3.bf16.msra.mxu1 %v1172_v12 }
  0x76   :  { %606 = vmatmul.mubr.bf16.vlgmr.msra.gmra.mxu0 %v92_v6  ;;  %1079 = vmatprep.subr.bf16.mxu1 %v1299_v43 }
  0x77   :  { %1103 = vmatprep.mubr.msk.bf16.mxu0 %vm1300_vm0, %v1299_v43  ;;  %1088 = vmatpush3.bf16.msra.mxu0 %v1175_v15 }
  0x78   :  { %1089 = vmatprep.subr.bf16.mxu0 %v1299_v43 }
  0x79   :  { %1080 = vmatpush3.bf16.msra.mxu1 %v1173_v13 }
  0x7a   :  { %1081 = vmatprep.subr.bf16.mxu1 %v1299_v43 }
  0x7b   :  { %1090 = vmatpush3.bf16.msra.mxu0 %v1176_v16 }
  0x7c   :  { %1091 = vmatprep.subr.bf16.mxu0 %v1299_v43 }
  0x7d   :  { %1082 = vmatpush3.bf16.msra.mxu1 %v1174_v14 }
  0x7f   :  { %1092 = vmatpush3.bf16.msra.mxu0 %v1177_v17 }
  0x80   :  { %1093 = vmatprep.subr.bf16.mxu0 %v1299_v43 }
  0x83   :  { %1094 = vmatpush3.bf16.msra.mxu0 %v1178_v18 }
  0x84   :  { %1095 = vmatprep.subr.bf16.mxu0 %v1299_v43 }
  0x87   :  { %1096 = vmatpush3.bf16.msra.mxu0 %v1179_v19 }
  0x88   :  { %1097 = vmatprep.subr.bf16.mxu0 %v1299_v43 }
  0x8b   :  { %1098 = vmatpush3.bf16.msra.mxu0 %v1180_v20 }
  0x8c   :  { %1099 = vmatprep.subr.bf16.mxu0 %v1299_v43 }
  0x8f   :  { %1100 = vmatpush3.bf16.msra.mxu0 %v1181_v53 }
  0x90   :  { %1101 = vmatprep.subr.bf16.mxu0 %v1299_v43 }
  0x93   :  { %1102 = vmatpush3.bf16.msra.mxu0 %v1182_v54 }
 0x116   :  { %v991_v25 = vpop.f32.mrf.mxu0 }
 0x117   :  { %v1013_v21 = vpop.f32.mrf.mxu1 }
 0x118   :  { %v992_v28 = vpop.f32.mrf.mxu0 }
 0x119   :  { %v1014_v22 = vpop.f32.mrf.mxu1  ;;  %v993_v33 = vadd.f32 %v992_v28, %v991_v25 }
 0x11a   :  { %v994_v31 = vpop.f32.mrf.mxu0  ;;  %v1015_v34 = vadd.f32 %v1014_v22, %v1013_v21 }
 0x11b   :  { %v1016_v23 = vpop.f32.mrf.mxu1 }
 0x11c   :  { %v995_v32 = vpop.f32.mrf.mxu0  ;;  %v567_v37 = vadd.f32 %v1015_v34, %v993_v33 }
 0x11d   :  { %v1017_v24 = vpop.f32.mrf.mxu1  ;;  %v996_v38 = vadd.f32 %v995_v32, %v994_v31 }
 0x11e   :  { %v1018_v39 = vadd.f32 %v1017_v24, %v1016_v23 }
 0x11f   :  { %v648_v26 = vpop.f32.mrf.mxu1 }
 0x120   :  { %v570_v45 = vadd.f32 %v1018_v39, %v996_v38 }
 0x121   :  { %v1065_v27 = vpop.f32.mrf.mxu1 }
 0x123   :  { %v651_v29 = vpop.f32.mrf.mxu1 }
 0x125   :  { %v1066_v30 = vpop.f32.mrf.mxu1 }
 0x136   :  { %v1035_v35 = vpop.f32.mrf.mxu0 }
 0x138   :  { %v1036_v36 = vpop.f32.mrf.mxu0 }
 0x139   :  { %v1037_v40 = vadd.f32 %v1036_v36, %v1035_v35 }
 0x13a   :  { %v1038_v41 = vpop.f32.mrf.mxu0 }
 0x13b   :  { %v608_v42 = vadd.f32 %v1037_v40, %v567_v37 }
 0x13c   :  { %v1039_v44 = vpop.f32.mrf.mxu0 }
 0x13d   :  { %v1040_v46 = vadd.f32 %v1039_v44, %v1038_v41  ;;  %v649_v47 = vadd.f32 %v648_v26, %v608_v42 }
 0x13f   :  { %v611_v48 = vadd.f32 %v1040_v46, %v570_v45  ;;  %v655_v50 = vmax.f32 %v649_v47, 0.0 }
 0x141   :  { %v652_v49 = vadd.f32 %v651_v29, %v611_v48 }
 0x143   :  { %v656_v51 = vmax.f32 %v652_v49, 0.0 }
 0x145   :  { %v657_v52 = vpack.c.bf16 %v656_v51, %v655_v50 }
 0x147   :  { %1084 = vmatmul.mubr.bf16.vlgmr.msra.gmra.mxu1 %v657_v52 }
 0x207   :  { %v756_v55 = vpop.f32.mrf.mxu1 }
 0x208   :  { %v763_v58 = vmax.f32 %v756_v55, 0.0 }
 0x209   :  { %v1085_v56 = vpop.f32.mrf.mxu1 }
 0x20b   :  { %v759_v57 = vpop.f32.mrf.mxu1 }
 0x20c   :  { %v764_v59 = vmax.f32 %v759_v57, 0.0 }
 0x20d   :  { %v1086_v60 = vpop.f32.mrf.mxu1 }
 0x20e   :  { %v765_v61 = vpack.c.bf16 %v764_v59, %v763_v58 }
 0x210   :  { %1104 = vmatmul.mubr.bf16.vlgmr.msra.gmra.mxu0 %v765_v61 }
 0x2d0   :  { %v864_v62 = vpop.f32.mrf.mxu0 }
 0x2d2   :  { %v1105_v63 = vpop.f32.mrf.mxu0 }
 0x2d4   :  { %v867_v0 = vpop.f32.mrf.mxu0 }
 0x2d5   :  { %v973_v1 = vpack.c.bf16 %v867_v0, %v864_v62 }
 0x2d6   :  { %v1106_v2 = vpop.f32.mrf.mxu0 }
 0x2d7   :  { %974 = vst [vmem:[#allocation10] sm:$0xff] %v973_v1  }
 0x2d8   :  { %1274 = shalt.err (!%p1271_p10)
}
 0x2d9   :  { %892 = dma.vmem_to_hbm [thread:$0]  %s887_s3, 128, %s1381_s4, [#allocation4], %s1292_s18, %s1292_s18, %s1293_s19  }
 0x2da   :  { %1289 = dma.done.wait [#allocation4], 128  }
 0x2db   :  { %1290 = vsyncadd [#allocation4], 4294967168 }
 0x2dc   :  { %896 = vsyncpa [#allocation3], 1 }
 0x2dd   :  { %897 = vsyncpa [#allocation6], 1 }
 0x2de   :  { %898 = vsyncpa [#allocation9], 1 }
 0x2df   :  { %899 = vsyncpa [#allocation4], 1 }

</bundles_post_ra>
